<compile_context>
chip_gen: v5e
topology: v5e:2x2
jax: 0.10.0
libtpu: 0.0.40
codegen_flags: <defaults>
</compile_context>

<pallas_src>
import functools

import jax
import jax.numpy as jnp
from jax import lax
from jax.experimental import pallas as pl
from jax.experimental.pallas import tpu as pltpu


# ------------------------- in-kernel stencil -------------------------

def _sobel_2d(xs, H, W):
    """Sobel gx/gy on a flattened (Nb*H, W) f32 channel-summed plane.

    Zero padding is emulated with XLU rolls + iota border masks, so no padded
    scratch or misaligned vreg copies are materialized.  The roll wrap-around
    lands exactly on the masked border rows/cols, so flattening the batch into
    the sublane axis is safe.
    """
    R = xs.shape[0]                                            # R = Nb * H
    ri = lax.broadcasted_iota(jnp.int32, (R, W), 0) % H        # within-image row
    ci = lax.broadcasted_iota(jnp.int32, (R, W), 1)            # column index

    # Vertical (sublane) neighbours with zero padding.
    up = jnp.where(ri == 0, 0.0, pltpu.roll(xs, shift=1, axis=0))        # x[i-1, j]
    down = jnp.where(ri == H - 1, 0.0, pltpu.roll(xs, shift=R - 1, axis=0))  # x[i+1, j]

    sv = up + 2.0 * xs + down        # vertical smooth [1, 2, 1]
    dv = up - down                   # vertical diff   [1, 0, -1]

    # Horizontal (lane) neighbours with zero padding.
    sv_l = jnp.where(ci == 0, 0.0, pltpu.roll(sv, shift=1, axis=1))
    sv_r = jnp.where(ci == W - 1, 0.0, pltpu.roll(sv, shift=W - 1, axis=1))
    dv_l = jnp.where(ci == 0, 0.0, pltpu.roll(dv, shift=1, axis=1))
    dv_r = jnp.where(ci == W - 1, 0.0, pltpu.roll(dv, shift=W - 1, axis=1))

    gx = sv_l - sv_r                 # horizontal diff   [1, 0, -1]
    gy = dv_l + 2.0 * dv + dv_r      # horizontal smooth [1, 2, 1]
    return gx, gy


def _grad_kernel(x_ref, gx_ref, gy_ref):
    # x_ref: (Nb, C, H, W)    gx_ref/gy_ref: (Nb, H, W)
    Nb, _, H, W = x_ref.shape
    # Identical 3x3 weights across the C input channels -> fold the channel sum
    # before the spatial stencil (cast per block; no wrapper-side cast).
    xs = jnp.sum(x_ref[...].astype(jnp.float32), axis=1)       # (Nb, H, W)
    gx, gy = _sobel_2d(xs.reshape(Nb * H, W), H, W)
    gx_ref[...] = gx.reshape(Nb, H, W).astype(gx_ref.dtype)
    gy_ref[...] = gy.reshape(Nb, H, W).astype(gy_ref.dtype)


def _mean_kernel(x_ref, psum_ref):
    # x_ref: (Nb, C, H, W)    psum_ref: (1, 1, W) lane-dense partial sums
    Nb, _, H, W = x_ref.shape
    xs = jnp.sum(x_ref[...].astype(jnp.float32), axis=1)
    gx, gy = _sobel_2d(xs.reshape(Nb * H, W), H, W)
    mag = jnp.sqrt(gx * gx + gy * gy)                          # (Nb*H, W)
    # Single sublane reduction per grid step; lane-dense (1, W) writeback.
    psum_ref[0] = jnp.sum(mag, axis=0, keepdims=True)


# ------------------------- block sizing -------------------------

_FALLBACK_VMEM_CAP = 64 << 20       # conservative: v7x per-TC physical VMEM


@functools.lru_cache(maxsize=None)
def _vmem_capacity_bytes():
    try:
        return int(pltpu.get_tpu_info().vmem_capacity_bytes)
    except Exception:
        return _FALLBACK_VMEM_CAP


def _vmem_limit_bytes():
    # 96 MiB on 128-MiB parts (v5e/v6e), 48 MiB on 64-MiB v7x.
    return int(min((3 * _vmem_capacity_bytes()) // 4, 96 << 20))


def _choose_nb(N, C, H, W, in_bytes, out_bytes, *, mean):
    """Images per grid step, sized against the per-generation VMEM limit."""
    budget = (2 * _vmem_limit_bytes()) // 3     # headroom for regalloc slack
    if mean:
        # 2x double-buffered input + ~10 live f32 intermediate planes.
        per_img = H * W * (2 * C * in_bytes + 10 * 4)
    else:
        # 2x double-buffered input + 2 outputs x 2 buffers + ~8 f32 intermediates.
        per_img = H * W * (2 * C * in_bytes + 4 * out_bytes + 8 * 4)
    nb = max(1, min(N, budget // max(per_img, 1)))
    if N >= 2:
        nb = min(nb, N // 2)        # keep >=2 grid steps so both v7x TCs get work
    nb = max(nb, 1)
    while N % nb:
        nb -= 1
    return nb


# ------------------------- wrappers -------------------------

def _sobel_grads(x):
    """x: (N, C, H, W) -> (gx, gy), each (N, H, W) in x.dtype."""
    N, C, H, W = x.shape
    out_dtype = x.dtype
    nb = _choose_nb(N, C, H, W, x.dtype.itemsize,
                    jnp.dtype(out_dtype).itemsize, mean=False)
    out_sd = jax.ShapeDtypeStruct((N, H, W), out_dtype)
    return pl.pallas_call(
        _grad_kernel,
        out_shape=(out_sd, out_sd),
        grid_spec=pltpu.PrefetchScalarGridSpec(
            num_scalar_prefetch=0,
            grid=(N // nb,),
            in_specs=[pl.BlockSpec((nb, C, H, W), lambda n: (n, 0, 0, 0))],
            out_specs=[pl.BlockSpec((nb, H, W), lambda n: (n, 0, 0))] * 2,
        ),
        compiler_params=pltpu.CompilerParams(
            dimension_semantics=("parallel",),
            vmem_limit_bytes=_vmem_limit_bytes()),
    )(x)


def _sobel_mean(x):
    """x: (N, C, H, W) -> scalar mean(sqrt(Gx^2 + Gy^2))."""
    N, C, H, W = x.shape
    nb = _choose_nb(N, C, H, W, x.dtype.itemsize, 4, mean=True)
    nblk = N // nb
    psum = pl.pallas_call(
        _mean_kernel,
        out_shape=jax.ShapeDtypeStruct((nblk, 1, W), jnp.float32),
        grid_spec=pltpu.PrefetchScalarGridSpec(
            num_scalar_prefetch=0,
            grid=(nblk,),
            in_specs=[pl.BlockSpec((nb, C, H, W), lambda n: (n, 0, 0, 0))],
            out_specs=pl.BlockSpec((1, 1, W), lambda n: (n, 0, 0)),
        ),
        compiler_params=pltpu.CompilerParams(
            dimension_semantics=("parallel",),
            vmem_limit_bytes=_vmem_limit_bytes()),
    )(x)
    return jnp.sum(psum) / jnp.float32(N * H * W)


def gradient_loss(x, mean=False):
    """JAX/Pallas equivalent of GradientLoss.forward (no wrapper dtype cast)."""
    if mean:
        return _sobel_mean(x)
    gx, gy = _sobel_grads(x)
    # Restore the PyTorch (N, 1, H, W) channel dim (free reshape in XLA).
    return gx[:, None], gy[:, None]


# ---------------- reference (plain JAX) for verification ----------------

def _reference(x, mean=False):
    filt_x = jnp.array([[[1, 0, -1], [2, 0, -2], [1, 0, -1]]] * 3,
                       dtype=jnp.float32)[None]            # (1, 3, 3, 3) OIHW
    filt_y = jnp.array([[[1, 2, 1], [0, 0, 0], [-1, -2, -1]]] * 3,
                       dtype=jnp.float32)[None]
    dn = lax.conv_dimension_numbers(x.shape, filt_x.shape,
                                    ("NCHW", "OIHW", "NCHW"))
    conv = lambda w: lax.conv_general_dilated(
        x.astype(jnp.float32), w, window_strides=(1, 1),
        padding=((1, 1), (1, 1)), dimension_numbers=dn)
    gx, gy = conv(filt_x), conv(filt_y)
    if mean:
        return jnp.mean(jnp.sqrt(gx * gx + gy * gy).reshape(-1))
    return gx, gy


if __name__ == "__main__":
    key = jax.random.PRNGKey(0)
    # Input must have 3 channels (Sobel weight has in_channels=3).
    # W=128 keeps the lane dim vreg-aligned (lane-dense stores / rolls).
    x = jax.random.normal(key, (2, 3, 16, 128), dtype=jnp.float32)

    gx, gy = gradient_loss(x, mean=False)
    loss = gradient_loss(x, mean=True)
    jax.block_until_ready((gx, gy, loss))

    gx_ref, gy_ref = _reference(x, mean=False)
    loss_ref = _reference(x, mean=True)

    assert gx.shape == (2, 1, 16, 128) and gy.shape == (2, 1, 16, 128)
    assert jnp.allclose(gx, gx_ref, atol=1e-4, rtol=1e-4)
    assert jnp.allclose(gy, gy_ref, atol=1e-4, rtol=1e-4)
    assert jnp.allclose(loss, loss_ref, atol=1e-4, rtol=1e-4)

    print("KERNEL_OK")
</pallas_src>

<mosaic_0001>
module attributes {stable_mosaic.version = 11 : i64} {
  func.func @_grad_kernel(%arg0: i32, %arg1: memref<1x3x16x128xf32, #tpu.memory_space<vmem>>, %arg2: memref<1x16x128xf32, #tpu.memory_space<vmem>>, %arg3: memref<1x16x128xf32, #tpu.memory_space<vmem>>) attributes {dimension_semantics = [#tpu.dimension_semantics<parallel>], iteration_bounds = array<i64: 2>, scalar_prefetch = 0 : i64, scratch_operands = 0 : i64, tpu.core_type = #tpu.core_type<tc>, window_params = [{transform_indices = @transform_0, window_bounds = array<i64: 1, 3, 16, 128>}, {transform_indices = @transform_1, window_bounds = array<i64: 1, 16, 128>}, {transform_indices = @transform_2, window_bounds = array<i64: 1, 16, 128>}]} {
    %c0 = arith.constant 0 : index
    %c0_0 = arith.constant 0 : index
    %c0_1 = arith.constant 0 : index
    %c0_2 = arith.constant 0 : index
    %0 = vector.load %arg1[%c0, %c0_0, %c0_1, %c0_2] : memref<1x3x16x128xf32, #tpu.memory_space<vmem>>, vector<1x3x16x128xf32>
    %cst = arith.constant dense<0.000000e+00> : vector<1x16x128xf32>
    %1 = vector.multi_reduction <add>, %0, %cst [1] : vector<1x3x16x128xf32> to vector<1x16x128xf32>
    %2 = vector.shape_cast %1 : vector<1x16x128xf32> to vector<16x128xf32>
    %3 = tpu.iota {dimensions = array<i32: 0>} : vector<16x128xi32>
    %c16_i32 = arith.constant 16 : i32
    %c0_i32 = arith.constant 0 : i32
    %4 = arith.cmpi eq, %c16_i32, %c0_i32 : i32
    %c1_i32 = arith.constant 1 : i32
    %5 = arith.select %4, %c1_i32, %c16_i32 : i32
    %6 = vector.broadcast %5 : i32 to vector<16x128xi32>
    %7 = arith.remsi %3, %6 : vector<16x128xi32>
    %c0_i32_3 = arith.constant 0 : i32
    %8 = vector.broadcast %c0_i32_3 : i32 to vector<16x128xi32>
    %9 = arith.cmpi ne, %7, %8 : vector<16x128xi32>
    %c0_i32_4 = arith.constant 0 : i32
    %10 = vector.broadcast %c0_i32_4 : i32 to vector<16x128xi32>
    %11 = arith.cmpi slt, %7, %10 : vector<16x128xi32>
    %c0_i32_5 = arith.constant 0 : i32
    %12 = arith.cmpi slt, %5, %c0_i32_5 : i32
    %13 = vector.broadcast %12 : i1 to vector<16x128xi1>
    %14 = vector.broadcast %13 : vector<16x128xi1> to vector<16x128xi1>
    %15 = arith.xori %11, %14 : vector<16x128xi1>
    %16 = arith.andi %15, %9 : vector<16x128xi1>
    %17 = vector.broadcast %5 : i32 to vector<16x128xi32>
    %18 = arith.addi %7, %17 : vector<16x128xi32>
    %19 = arith.select %16, %18, %7 : vector<16x128xi1>, vector<16x128xi32>
    %20 = tpu.iota {dimensions = array<i32: 1>} : vector<16x128xi32>
    %c0_i32_6 = arith.constant 0 : i32
    %21 = vector.broadcast %c0_i32_6 : i32 to vector<16x128xi32>
    %22 = arith.cmpi eq, %19, %21 : vector<16x128xi32>
    %c1_i32_7 = arith.constant 1 : i32
    %23 = tpu.dynamic_rotate %2 by %c1_i32_7 dim 0 : vector<16x128xf32>, i32 -> vector<16x128xf32>
    %cst_8 = arith.constant 0.000000e+00 : f32
    %24 = vector.broadcast %cst_8 : f32 to vector<16x128xf32>
    %25 = arith.select %22, %24, %23 : vector<16x128xi1>, vector<16x128xf32>
    %c15_i32 = arith.constant 15 : i32
    %26 = vector.broadcast %c15_i32 : i32 to vector<16x128xi32>
    %27 = arith.cmpi eq, %19, %26 : vector<16x128xi32>
    %c15_i32_9 = arith.constant 15 : i32
    %28 = tpu.dynamic_rotate %2 by %c15_i32_9 dim 0 : vector<16x128xf32>, i32 -> vector<16x128xf32>
    %cst_10 = arith.constant 0.000000e+00 : f32
    %29 = vector.broadcast %cst_10 : f32 to vector<16x128xf32>
    %30 = arith.select %27, %29, %28 : vector<16x128xi1>, vector<16x128xf32>
    %cst_11 = arith.constant 2.000000e+00 : f32
    %31 = vector.broadcast %cst_11 : f32 to vector<16x128xf32>
    %32 = arith.mulf %31, %2 : vector<16x128xf32>
    %33 = arith.addf %25, %32 : vector<16x128xf32>
    %34 = arith.addf %33, %30 : vector<16x128xf32>
    %35 = arith.subf %25, %30 : vector<16x128xf32>
    %c0_i32_12 = arith.constant 0 : i32
    %36 = vector.broadcast %c0_i32_12 : i32 to vector<16x128xi32>
    %37 = arith.cmpi eq, %20, %36 : vector<16x128xi32>
    %c1_i32_13 = arith.constant 1 : i32
    %38 = tpu.dynamic_rotate %34 by %c1_i32_13 dim 1 : vector<16x128xf32>, i32 -> vector<16x128xf32>
    %cst_14 = arith.constant 0.000000e+00 : f32
    %39 = vector.broadcast %cst_14 : f32 to vector<16x128xf32>
    %40 = arith.select %37, %39, %38 : vector<16x128xi1>, vector<16x128xf32>
    %c127_i32 = arith.constant 127 : i32
    %41 = vector.broadcast %c127_i32 : i32 to vector<16x128xi32>
    %42 = arith.cmpi eq, %20, %41 : vector<16x128xi32>
    %c127_i32_15 = arith.constant 127 : i32
    %43 = tpu.dynamic_rotate %34 by %c127_i32_15 dim 1 : vector<16x128xf32>, i32 -> vector<16x128xf32>
    %cst_16 = arith.constant 0.000000e+00 : f32
    %44 = vector.broadcast %cst_16 : f32 to vector<16x128xf32>
    %45 = arith.select %42, %44, %43 : vector<16x128xi1>, vector<16x128xf32>
    %c0_i32_17 = arith.constant 0 : i32
    %46 = vector.broadcast %c0_i32_17 : i32 to vector<16x128xi32>
    %47 = arith.cmpi eq, %20, %46 : vector<16x128xi32>
    %c1_i32_18 = arith.constant 1 : i32
    %48 = tpu.dynamic_rotate %35 by %c1_i32_18 dim 1 : vector<16x128xf32>, i32 -> vector<16x128xf32>
    %cst_19 = arith.constant 0.000000e+00 : f32
    %49 = vector.broadcast %cst_19 : f32 to vector<16x128xf32>
    %50 = arith.select %47, %49, %48 : vector<16x128xi1>, vector<16x128xf32>
    %c127_i32_20 = arith.constant 127 : i32
    %51 = vector.broadcast %c127_i32_20 : i32 to vector<16x128xi32>
    %52 = arith.cmpi eq, %20, %51 : vector<16x128xi32>
    %c127_i32_21 = arith.constant 127 : i32
    %53 = tpu.dynamic_rotate %35 by %c127_i32_21 dim 1 : vector<16x128xf32>, i32 -> vector<16x128xf32>
    %cst_22 = arith.constant 0.000000e+00 : f32
    %54 = vector.broadcast %cst_22 : f32 to vector<16x128xf32>
    %55 = arith.select %52, %54, %53 : vector<16x128xi1>, vector<16x128xf32>
    %56 = arith.subf %40, %45 : vector<16x128xf32>
    %cst_23 = arith.constant 2.000000e+00 : f32
    %57 = vector.broadcast %cst_23 : f32 to vector<16x128xf32>
    %58 = arith.mulf %57, %35 : vector<16x128xf32>
    %59 = arith.addf %50, %58 : vector<16x128xf32>
    %60 = arith.addf %59, %55 : vector<16x128xf32>
    %61 = vector.shape_cast %56 : vector<16x128xf32> to vector<1x16x128xf32>
    %c0_24 = arith.constant 0 : index
    %c0_25 = arith.constant 0 : index
    %c0_26 = arith.constant 0 : index
    %62 = vector.load %arg2[%c0_24, %c0_25, %c0_26] : memref<1x16x128xf32, #tpu.memory_space<vmem>>, vector<1x16x128xf32>
    tpu.vector_store %arg2[%c0_24, %c0_25, %c0_26], %61 {strides = array<i32>} : memref<1x16x128xf32, #tpu.memory_space<vmem>>, vector<1x16x128xf32>,
    %63 = vector.shape_cast %60 : vector<16x128xf32> to vector<1x16x128xf32>
    %c0_27 = arith.constant 0 : index
    %c0_28 = arith.constant 0 : index
    %c0_29 = arith.constant 0 : index
    %64 = vector.load %arg3[%c0_27, %c0_28, %c0_29] : memref<1x16x128xf32, #tpu.memory_space<vmem>>, vector<1x16x128xf32>
    tpu.vector_store %arg3[%c0_27, %c0_28, %c0_29], %63 {strides = array<i32>} : memref<1x16x128xf32, #tpu.memory_space<vmem>>, vector<1x16x128xf32>,
    return
  }
  func.func @transform_0(%arg0: i32) -> (i32, i32, i32, i32) {
    %c0_i32 = arith.constant 0 : i32
    %c0_i32_0 = arith.constant 0 : i32
    %c0_i32_1 = arith.constant 0 : i32
    %c0_i32_2 = arith.constant 0 : i32
    return %arg0, %c0_i32, %c0_i32_0, %c0_i32_1 : i32, i32, i32, i32
  }
  func.func @transform_1(%arg0: i32) -> (i32, i32, i32) {
    %c0_i32 = arith.constant 0 : i32
    %c0_i32_0 = arith.constant 0 : i32
    %c0_i32_1 = arith.constant 0 : i32
    return %arg0, %c0_i32, %c0_i32_0 : i32, i32, i32
  }
  func.func @transform_2(%arg0: i32) -> (i32, i32, i32) {
    %c0_i32 = arith.constant 0 : i32
    %c0_i32_0 = arith.constant 0 : i32
    %c0_i32_1 = arith.constant 0 : i32
    return %arg0, %c0_i32, %c0_i32_0 : i32, i32, i32
  }
}

</mosaic_0001>

<bundles_post_ra>
// kernel: tpu_custom_call.1
= control target key start
LH: loop header
LB: loop body
LE: loop exit
PB: predicated region body
PF: predicated region fallthrough
CT: control target
= control target key end

     0   :  { %8 = vsyncpa [#allocation3], 0  ;;  %s806_s0 = inlined_call_operand.hbm [shape: f32[2,3,16,128], index: 0, kind: input, shape index: {}]   ;;  %s807_s1 = inlined_call_operand.hbm [shape: f32[2,16,128], index: 1, kind: output, shape index: {0}]   ;;  %s808_s2 = inlined_call_operand.hbm [shape: f32[2,16,128], index: 2, kind: output, shape index: {1}]  }
   0x1   :  { %10 = vsyncpa [#allocation3 + $0x1], 0 }
   0x2   :  { %11 = vsyncpa [#allocation4], 0 }
   0x3   :  { %13 = vsyncpa [#allocation4 + $0x1], 0 }
   0x4   :  { %14 = vsyncpa [#allocation7], 0 }
   0x5   :  { %16 = vsyncpa [#allocation7 + $0x1], 0  ;;  %s650_s9 = smov 0   ;;  %s652_s10 = smov 0  }
   0x6   :  { %s654_s11 = smov 0   ;;  %s656_s12 = smov 0  }
   0x7 LB: > { %s671_s13 = sadd.s32 4294967295, %s627_s12   ;;  %s422_s14 = sadd.s32 4294967294, %s627_s12   ;;  %s627_s12 = sphi %s656_s12, %s816_s12   ;;  %s623_s11 = sphi %s654_s11, %s815_s11   ;;  %s619_s10 = sphi %s652_s10, %s814_s10   ;;  %s615_s9 = sphi %s650_s9, %s813_s9  }
   0x8   : > { %s675_s15 = sadd.s32 1, %s627_s12   ;;  %s29_s16 = sadd.s32 1, %s623_s11 }
   0x9   : > { %s26_s17 = ssub.s32 %s627_s12, %s675_s15  ;;  %p36_p0 = scmp.ne.s32.totalorder %s623_s11, %s619_s10 }
   0xa   : > { %p27_p1 = scmp.eq.s32.totalorder %s26_s17, 0  ;;  %p37_p2 = scmp.eq.s32.totalorder %s627_s12, 0 }
   0xb   : > { %p42_p3 = scmp.ne.s32.totalorder %s619_s10, %s615_s9  ;;  %p43_p4 = scmp.eq.s32.totalorder %s671_s13, 0 }
   0xc   : > { %s687_s18 = scalar_select %p27_p1, %s623_s11, %s29_s16  }
   0xd   : > { %p38_p5 = por %p37_p2, %p36_p0  ;;  %p689_p6 = por %p43_p4, %p42_p3 }
   0xe   : > { %p66_p7 = scmp.eq.s32.totalorder %s671_s13, 1  ;;  %p72_p8 = scmp.eq.s32.totalorder %s422_s14, 1 }
   0xf   : > { %p424_p9 = scmp.ge.s32.totalorder %s627_s12, 2  ;;  %p459_p10 = scmp.lt.s32.totalorder %s627_s12, 2 }
  0x10   : > { %p696_p11 = por %p66_p7, %p36_p0  ;;  %p700_p12 = por %p72_p8, %p42_p3 }
  0x11   : > { %s118_s22 = sand.u32 1, %s623_s11   ;;  %s440_s23 = smul.u32 48, %s627_s12 }
  0x12   : > { %s439_s24 = smul.u32 48, %s118_s22  ;;  %p709_p13 = pnand %p459_p10, %p38_p5 }
  0x13   : > { %s127_s27 = scalar_lea.hbm %s806_s0, %s440_s23  ;;  %s119_s4 = scalar_lea.sflag [#allocation3], %s118_s22 }
  0x14   : > { %s128_s29 = sshll.u32 %s127_s27, 4  ;;  %s122_s30 = scalar_lea.vmem [#allocation2], %s439_s24  ;;  %s129_s29 = int_to_ptr.hbm [resolvable:$true] %s128_s29 }
  0x15   : > { %s130_s3 = sshll.u32 %s122_s30, 4  ;;  %s499_s5 = sshra.s32 %s129_s29, 4  ;;  %s131_s3 = int_to_ptr.vmem [resolvable:$true] %s130_s3  ;;  %s500_s5 = int_to_ptr.hbm [resolvable:$true] %s499_s5 }
  0x16   : > { %s501_s6 = scalar_lea.hbm %s500_s5, 48  ;;  %p503_p1 = pneg %p709_p13 }
  0x17   : > { %p502_p0 = scmp.ne.s32.totalorder %s500_s5, %s501_s6  ;;  %s506_s14 = scalar_lea.hbm %s806_s0, 96 }
  0x18   : > { %p507_p4 = scmp.lt.s32.totalorder %s500_s5, %s806_s0  ;;  %p508_p5 = scmp.lt.s32.totalorder %s506_s14, %s501_s6 }
  0x19   : > { %p504_p2 = pnand %p503_p1, %p502_p0 }
  0x1a   : > { %p509_p7 = por %p508_p5, %p507_p4 }
  0x1b   : > { %p505_p3 = pneg %p504_p2 }
  0x1d   : > { %p510_p8 = pnand %p509_p7, %p505_p3 }
  0x1f   : > { %513 = shalt.err (!%p510_p8)
}
  0x20   : > { %s629_s22 = smov 128   ;;  %s630_s23 = smov 8  }
  0x21   : > { %451 = dma.hbm_to_vmem [thread:$0]  (!%p709_p13), %s129_s29, 768, %s131_s3, %s119_s4, %s629_s22, %s629_s22, %s630_s23  }
  0x22   : > { %p426_p10 = scmp.ge.s32.totalorder %s627_s12, 1  ;;  %p138_p0 = scmp.lt.s32.totalorder %s627_s12, 3 }
  0x24   : > { %p139_p1 = pnand %p426_p10, %p138_p0 }
  0x25   : > { %s726_s24 = sand.u32 (!%p139_p1), 1, %s619_s10  }
  0x26   : > { %142 = sbr.rel (%p139_p1) target bundleno = 202 (0xca), region = 24  ;;  %s145_s26 = scalar_lea.sflag (!%p139_p1), [#allocation3], %s726_s24 }
  0x27   : > { %s441_s25 = smul.u32 (!%p139_p1), 48, %s726_s24 }
  0x29   : > { %s148_s27 = scalar_lea.vmem (!%p139_p1), [#allocation2], %s441_s25 }
  0x2b   : > { %602 = dma.done.wait (%p689_p6), %s145_s26, 768  }
  0x2c   : > { %604 = vsyncadd (%p689_p6), %s145_s26, 4294966528  ;;  %v185_v0 = vlaneseq  ;;  %v175_v3 = vld [vmem:[%s148_s27] sm:$0xff]  ;;  %v176_v4 = vld [vmem:[%s148_s27 + $0x8] sm:$0xff]  ;;  %s631_s19 = smov 1   ;;  %s632_s28 = smov 127  }
  0x2d   : > { %v177_v5 = vld [vmem:[%s148_s27 + $0x10] sm:$0xff]  ;;  %v178_v6 = vld [vmem:[%s148_s27 + $0x18] sm:$0xff]  ;;  %v179_v7 = vld [vmem:[%s148_s27 + $0x20] sm:$0xff]  ;;  %s427_s29 = sshll.u32 %s726_s24, 4  ;;  %s437_s30 = sshll.u32 %s671_s13, 4 }
  0x2e   : > { %v186_v1 = vshrl.u32 %v185_v0, 7  ;;  %v180_v8 = vld [vmem:[%s148_s27 + $0x28] sm:$0xff]  ;;  %v181_v9 = vadd.f32 %v177_v5, %v175_v3  ;;  %v183_v12 = vadd.f32 %v178_v6, %v176_v4  ;;  %v213_v34 = vand.u32 127, %v185_v0  ;;  %s295_s5 = scalar_lea.hbm %s807_s1, %s437_s30  ;;  %s167_s6 = scalar_lea.vmem [#allocation5], %s427_s29 }
  0x2f   : > { %s296_s7 = sshll.u32 %s167_s6, 4  ;;  %s298_s8 = sshll.u32 %s295_s5, 4  ;;  %s744_s7 = int_to_ptr.vmem [resolvable:$true] %s296_s7  ;;  %s299_s8 = int_to_ptr.hbm [resolvable:$true] %s298_s8 }
  0x30   : > { %v187_v2 = vadd.s32 8, %v186_v1  ;;  %v192_v10 = vand.u32 15, %v186_v1  ;;  %v182_v13 = vadd.f32 %v181_v9, %v179_v7  ;;  %v184_v14 = vadd.f32 %v183_v12, %v180_v8  ;;  %s751_s16 = scalar_lea.hbm %s808_s2, %s437_s30  ;;  %s279_s17 = scalar_lea.sflag [#allocation4], %s726_s24 }
  0x31   : > { %vm218_vm0 = vcmp.lt.s32.totalorder %v186_v1, 1  ;;  %vm227_vm1 = vcmp.lt.s32.totalorder %v186_v1, 7  ;;  %vm247_vm4 = vcmp.eq.s32.totalorder %v213_v34, 127  ;;  %vm240_vm5 = vcmp.eq.s32.totalorder %v213_v34, 0  ;;  %s543_s22 = sshra.s32 %s299_s8, 4  ;;  %s549_s27 = scalar_lea.hbm %s807_s1, 32  ;;  %s544_s22 = int_to_ptr.hbm [resolvable:$true] %s543_s22 }
  0x32   : > { %v199_v11 = vand.u32 15, %v187_v2  ;;  %vm214_vm2 = vcmp.eq.s32.totalorder %v192_v10, 0  ;;  %v216_v15 = vrot.slane %v182_v13, 7  ;;  %v225_v16 = vrot.slane %v182_v13, 1  ;;  %s545_s23 = scalar_lea.hbm %s544_s22, 16  ;;  %p550_p3 = scmp.lt.s32.totalorder %s544_s22, %s807_s1 }
  0x33   : > { %v217_v17 = vrot.slane %v184_v14, 7  ;;  %v226_v18 = vrot.slane %v184_v14, 1  ;;  %v233_v19 = vmul.f32 2.0, %v184_v14  ;;  %v232_v20 = vmul.f32 2.0, %v182_v13  ;;  %p546_p6 = scmp.ne.s32.totalorder %s544_s22, %s545_s23  ;;  %p551_p4 = scmp.lt.s32.totalorder %s549_s27, %s545_s23 }
  0x34   : > { %vm224_vm3 = vcmp.eq.s32.totalorder %v199_v11, 15 }
  0x35   : > { %v220_v21 = vsel %vm218_vm0, %v217_v17, %v216_v15  ;;  %v228_v22 = vsel %vm227_vm1, %v225_v16, %v226_v18  ;;  %v219_v23 = vsel %vm218_vm0, %v216_v15, %v217_v17  ;;  %v229_v24 = vsel %vm227_vm1, %v226_v18, %v225_v16  ;;  %p547_p13 = pnand %p546_p6, %p696_p11  ;;  %p552_p5 = por %p551_p4, %p550_p3 }
  0x36   : > { %v221_v25 = vsel %vm214_vm2, 0.0, %v220_v21  ;;  %v231_v26 = vsel %vm224_vm3, 0.0, %v229_v24  ;;  %v235_v27 = vadd.f32 %v233_v19, %v219_v23 }
  0x37   : > { %v238_v28 = vsub.f32 %v221_v25, %v228_v22  ;;  %v234_v29 = vadd.f32 %v232_v20, %v221_v25  ;;  %v239_v32 = vsub.f32 %v219_v23, %v231_v26  ;;  %p548_p2 = pneg %p547_p13 }
  0x38   : > { %v237_v30 = vadd.f32 %v235_v27, %v231_v26 }
  0x39   : > { %254 = vrot.lane.b32.xlu0 %v238_v28, %s631_s19  ;;  %v236_v31 = vadd.f32 %v234_v29, %v228_v22  ;;  %v268_v46 = vmul.f32 2.0, %v238_v28  ;;  %v269_v48 = vmul.f32 2.0, %v239_v32  ;;  %p553_p7 = pnand %p552_p5, %p548_p2 }
  0x3a   : > { %243 = vrot.lane.b32.xlu1 %v237_v30, %s631_s19 }
  0x3b   : > { %248 = vrot.lane.b32.xlu2 %v236_v31, %s632_s28 }
  0x41   : > { %256 = vrot.lane.b32.xlu0 %v239_v32, %s631_s19 }
  0x42   : > { %241 = vrot.lane.b32.xlu1 %v236_v31, %s631_s19 }
  0x43   : > { %250 = vrot.lane.b32.xlu2 %v237_v30, %s632_s28 }
  0x49   : > { %260 = vrot.lane.b32.xlu0 %v238_v28, %s632_s28 }
  0x4a   : > { %262 = vrot.lane.b32.xlu1 %v239_v32, %s632_s28 }
  0x95   : > { %v249_v33 = vpop.permute.xlu2 %248 }
  0x96   : > { %v252_v41 = vsel %vm247_vm4, 0.0, %v249_v33 }
  0x9d   : > { %v251_v35 = vpop.permute.xlu2 %250 }
  0x9e   : > { %v253_v37 = vsel %vm247_vm4, 0.0, %v251_v35 }
  0xab   : > { %v255_v36 = vpop.permute.xlu0 %254 }
  0xac   : > { %v244_v38 = vpop.permute.xlu1 %243  ;;  %v258_v47 = vsel %vm240_vm5, 0.0, %v255_v36 }
  0xad   : > { %v246_v39 = vsel %vm240_vm5, 0.0, %v244_v38 }
  0xae   : > { %v267_v40 = vsub.f32 %v246_v39, %v253_v37 }
  0xb0   : > { %275 = vst [vmem:[%s167_s6 + $0x8] sm:$0xff] %v267_v40 }
  0xb3   : > { %v257_v42 = vpop.permute.xlu0 %256 }
  0xb4   : > { %v242_v43 = vpop.permute.xlu1 %241  ;;  %v259_v49 = vsel %vm240_vm5, 0.0, %v257_v42 }
  0xb5   : > { %v245_v44 = vsel %vm240_vm5, 0.0, %v242_v43 }
  0xb6   : > { %v266_v45 = vsub.f32 %v245_v44, %v252_v41 }
  0xb8   : > { %274 = vst [vmem:[%s167_s6] sm:$0xff] %v266_v45 }
  0xb9   : > { %556 = shalt.err (!%p553_p7)
}
  0xba   : > { %s633_s30 = smov 128   ;;  %s634_s3 = smov 8   ;;  %v270_v50 = vadd.f32 %v268_v46, %v258_v47  ;;  %v271_v52 = vadd.f32 %v269_v48, %v259_v49 }
  0xbb   : > { %444 = dma.vmem_to_hbm [thread:$0]  (%p696_p11), %s744_s7, 256, %s299_s8, %s279_s17, %s633_s30, %s633_s30, %s634_s3   ;;  %v261_v51 = vpop.permute.xlu0 %260 }
  0xbc   : > { %s174_s4 = scalar_lea.vmem [#allocation6], %s427_s29  ;;  %s315_s6 = sshll.u32 %s751_s16, 4  ;;  %v264_v53 = vsel %vm247_vm4, 0.0, %v261_v51  ;;  %v263_v54 = vpop.permute.xlu1 %262  ;;  %s316_s6 = int_to_ptr.hbm [resolvable:$true] %s315_s6 }
  0xbd   : > { %s313_s5 = sshll.u32 %s174_s4, 4  ;;  %v272_v55 = vadd.f32 %v270_v50, %v264_v53  ;;  %v265_v56 = vsel %vm247_vm4, 0.0, %v263_v54  ;;  %s284_s7 = scalar_lea.sflag [#allocation7], %s726_s24  ;;  %s314_s5 = int_to_ptr.vmem [resolvable:$true] %s313_s5 }
  0xbe   : > { %v273_v57 = vadd.f32 %v271_v52, %v265_v56  ;;  %s571_s8 = sshra.s32 %s316_s6, 4  ;;  %s577_s16 = scalar_lea.hbm %s808_s2, 32  ;;  %s572_s8 = int_to_ptr.hbm [resolvable:$true] %s571_s8 }
  0xbf   : > { %276 = vst [vmem:[%s174_s4] sm:$0xff] %v272_v55  ;;  %s573_s29 = scalar_lea.hbm %s572_s8, 16  ;;  %p578_p1 = scmp.lt.s32.totalorder %s572_s8, %s808_s2 }
  0xc0   : > { %277 = vst [vmem:[%s174_s4 + $0x8] sm:$0xff] %v273_v57  ;;  %p574_p8 = scmp.ne.s32.totalorder %s572_s8, %s573_s29  ;;  %p579_p6 = scmp.lt.s32.totalorder %s577_s16, %s573_s29 }
  0xc2   : > { %p575_p10 = pnand %p574_p8, %p696_p11  ;;  %p580_p13 = por %p579_p6, %p578_p1 }
  0xc4   : > { %p576_p0 = pneg %p575_p10 }
  0xc6   : > { %p581_p2 = pnand %p580_p13, %p576_p0 }
  0xc8   : > { %584 = shalt.err (!%p581_p2)
}
  0xc9   : > { %445 = dma.vmem_to_hbm [thread:$0]  (%p696_p11), %s314_s5, 256, %s316_s6, %s284_s7, %s633_s30, %s633_s30, %s634_s3  }
  0xca PF: > { %s330_s24 = sand.u32 1, %s615_s9   ;;  %p453_p3 = pnand %p424_p9, %p700_p12 }
  0xcb   : > { %s331_s23 = scalar_lea.sflag [#allocation4], %s330_s24 }
  0xcc   : > { %p454_p4 = pneg %p453_p3 }
  0xce   : > { %606 = dma.done.wait (%p454_p4), %s331_s23, 256  }
  0xcf   : > { %608 = vsyncadd (%p454_p4), %s331_s23, 4294967040  ;;  %s341_s25 = scalar_lea.sflag [#allocation7], %s330_s24 }
  0xd0   : > { %610 = dma.done.wait (%p454_p4), %s341_s25, 256  }
  0xd1   : > { %612 = vsyncadd (%p454_p4), %s341_s25, 4294967040  ;;  %p19_p11 = scmp.ge.s32.totalorder %s675_s15, 4   ;;  %s813_s9 = smov %s619_s10 }
  0xd2   : > { %s814_s10 = smov %s623_s11  ;;  %s815_s11 = smov %s687_s18 }
  0xd3   : > { %s816_s12 = smov %s675_s15  ;;  %21 = sbr.rel (!%p19_p11) target bundleno = 7 (0x7), region = 86 }
  0xd8   :  { %347 = vsyncpa [#allocation3], 1 }
  0xd9   :  { %349 = vsyncpa [#allocation3 + $0x1], 1 }
  0xda   :  { %350 = vsyncpa [#allocation4], 1 }
  0xdb   :  { %352 = vsyncpa [#allocation4 + $0x1], 1 }
  0xdc   :  { %353 = vsyncpa [#allocation7], 1 }
  0xdd   :  { %355 = vsyncpa [#allocation7 + $0x1], 1 }

</bundles_post_ra>
